<compile_context>
chip_gen: v5e
topology: v5e:2x2
jax: 0.10.0
libtpu: 0.0.40
codegen_flags: <defaults>
</compile_context>

<pallas_src>
import jax
import jax.numpy as jnp
from jax import lax
from jax.experimental import pallas as pl
from jax.experimental.pallas import tpu as pltpu

_INV_SQRT2 = 0.7071067811865476


def _round_up(x, n):
    return pl.cdiv(x, n) * n


def _nonlinear_head_kernel(x_ref, w1_ref, b1_ref, w2_ref, b2_ref, o_ref):
    # x_ref : (tm, D_in)       input row tile (native dtype)
    # w1_ref: (D_in, H)        linear1 weight, pre-transposed (in, out), resident
    # b1_ref: (1, H)           linear1 bias
    # w2_ref: (H, Dout_pad)    linear2 weight, pre-transposed, out lane-padded
    # b2_ref: (1, Dout_pad)    linear2 bias (lane-padded)
    # o_ref : (tm, Dout_pad)   lane-dense output tile
    x = x_ref[...].astype(w1_ref.dtype)           # no-op for matching dtypes

    # linear1: plain (tm, D_in) @ (D_in, H); f32 accumulation on the MXU.
    h = jnp.dot(x, w1_ref[...], preferred_element_type=jnp.float32)
    h = h + b1_ref[...].astype(jnp.float32)

    # exact (erf-based) GELU, matching torch.nn.functional.gelu default
    h = 0.5 * h * (1.0 + lax.erf(h * jnp.float32(_INV_SQRT2)))

    # linear2: (tm, H) @ (H, Dout_pad); feed h in the weight dtype so bf16
    # weights keep the fast MXU path.
    out = jnp.dot(h.astype(w2_ref.dtype), w2_ref[...],
                  preferred_element_type=jnp.float32)
    out = out + b2_ref[...].astype(jnp.float32)

    o_ref[...] = out.astype(o_ref.dtype)


def prepare_nonlinear_head_params(w1, b1, w2, b2, *, param_dtype=None):
    """One-time parameter prep (hoist this out of the hot path).

    w1: (hidden, input_dim)  b1: (hidden,)     -- PyTorch nn.Linear layout
    w2: (out_dim, hidden)    b2: (out_dim,)

    Returns (w1_t, b1_r, w2_t, b2_r, out_dim) with weights transposed to
    (in, out), the output feature axis lane-padded to a multiple of 128 and
    biases reshaped to (1, features). Optionally casts weights to param_dtype
    (e.g. bf16 for MXU peak on v6e/v7x; accuracy vs. the f32 reference drops).
    """
    hidden, in_dim = w1.shape
    out_dim = w2.shape[0]
    out_pad = _round_up(out_dim, 128)

    w1_t = jnp.transpose(w1)                      # (D_in, H)
    w2_t = jnp.transpose(w2)                      # (H, Dout)
    b2_p = b2
    if out_pad != out_dim:
        w2_t = jnp.pad(w2_t, ((0, 0), (0, out_pad - out_dim)))
        b2_p = jnp.pad(b2, ((0, out_pad - out_dim),))

    if param_dtype is not None:
        w1_t = w1_t.astype(param_dtype)
        w2_t = w2_t.astype(param_dtype)

    b1_r = b1.reshape(1, hidden)
    b2_r = b2_p.reshape(1, out_pad)
    return w1_t, b1_r, w2_t, b2_r, out_dim


def _vmem_budget_bytes():
    # Generation-aware VMEM cap: ~80% of physical capacity leaves headroom for
    # compiler-internal scratch (=> ~51 MiB on v7x, ~102 MiB on v5e/v6e).
    cap = 128 * 2**20
    try:
        info = pltpu.get_tpu_info()
        cap = int(getattr(info, "vmem_capacity_bytes", cap))
    except Exception:
        pass
    return max(32 * 2**20, int(cap * 0.80))


def nonlinear_head_apply(x, prepared, *, tm=256):
    """Apply NonLinearHead to x of shape (..., input_dim) with prepared params."""
    w1_t, b1_r, w2_t, b2_r, out_dim = prepared
    in_dim, hidden = w1_t.shape
    out_pad = w2_t.shape[1]
    assert x.shape[-1] == in_dim, (x.shape, in_dim)
    lead_shape = x.shape[:-1]

    x2d = x.reshape(-1, in_dim)
    m = x2d.shape[0]

    # Row tile: large (MXU fill + amortized grid-step cost), multiple of 8
    # (sublane), no larger than the 8-rounded problem size, and capped so the
    # parallel M axis has >= 2 steps when m is large (v7x dual-TC sharding).
    tm = max(8, min(tm, _round_up(m, 8)))
    tm = _round_up(tm, 8)
    if m > 2 * 128:
        tm = min(tm, max(128, _round_up(pl.cdiv(m, 2), 8)))
    grid_m = pl.cdiv(m, tm)   # ragged last tile handled by Pallas (masked store)

    x_bytes = jnp.dtype(x.dtype).itemsize
    w_bytes = (w1_t.size * jnp.dtype(w1_t.dtype).itemsize
               + w2_t.size * jnp.dtype(w2_t.dtype).itemsize
               + b1_r.size * jnp.dtype(b1_r.dtype).itemsize
               + b2_r.size * jnp.dtype(b2_r.dtype).itemsize)
    io_bytes = 2 * (tm * in_dim + tm * out_pad) * x_bytes   # double-buffered x / out tiles
    scratch_bytes = 4 * tm * max(hidden, out_pad) * 4       # f32 intermediates / regalloc slack
    needed = w_bytes + io_bytes + scratch_bytes              # weights single-buffered
    vmem_limit = int(min(max(needed, 32 * 2**20), _vmem_budget_bytes()))

    cost = pl.CostEstimate(
        flops=2 * m * (in_dim * hidden + hidden * out_pad),
        transcendentals=m * hidden,
        bytes_accessed=(m * in_dim + m * out_pad) * x_bytes + w_bytes,
    )

    resident = pl.Buffered(1)   # constant index_map -> never re-DMA'd; 1 buffer is enough

    out2d = pl.pallas_call(
        _nonlinear_head_kernel,
        out_shape=jax.ShapeDtypeStruct((m, out_pad), x.dtype),
        grid_spec=pltpu.PrefetchScalarGridSpec(
            num_scalar_prefetch=0,
            grid=(grid_m,),
            in_specs=[
                pl.BlockSpec((tm, in_dim), lambda i: (i, 0)),               # x row tile
                pl.BlockSpec((in_dim, hidden), lambda i: (0, 0),
                             pipeline_mode=resident),                       # W1^T (resident)
                pl.BlockSpec((1, hidden), lambda i: (0, 0),
                             pipeline_mode=resident),                       # b1
                pl.BlockSpec((hidden, out_pad), lambda i: (0, 0),
                             pipeline_mode=resident),                       # W2^T (resident, padded)
                pl.BlockSpec((1, out_pad), lambda i: (0, 0),
                             pipeline_mode=resident),                       # b2 (padded)
            ],
            out_specs=pl.BlockSpec((tm, out_pad), lambda i: (i, 0)),
        ),
        compiler_params=pltpu.CompilerParams(
            dimension_semantics=("parallel",),
            vmem_limit_bytes=vmem_limit,
        ),
        cost_estimate=cost,
    )(x2d, w1_t, b1_r, w2_t, b2_r)

    out2d = out2d[:, :out_dim]
    return out2d.reshape(*lead_shape, out_dim)


def nonlinear_head(x, w1, b1, w2, b2, *, tm=256, param_dtype=None):
    """Convenience wrapper: per-call param prep + apply (hoist prep for hot loops)."""
    prepared = prepare_nonlinear_head_params(w1, b1, w2, b2, param_dtype=param_dtype)
    return nonlinear_head_apply(x, prepared, tm=tm)


def _ref_forward(x, w1, b1, w2, b2):
    h = jnp.einsum("...i,hi->...h", x, w1) + b1
    h = 0.5 * h * (1.0 + lax.erf(h * jnp.float32(_INV_SQRT2)))
    return jnp.einsum("...h,oh->...o", h, w2) + b2


if __name__ == "__main__":
    # NonLinearHead(input_dim=32, out_dim=16, activation_fn="gelu") -> hidden = input_dim = 32
    batch, seq = 2, 8
    input_dim, hidden, out_dim = 32, 32, 16

    key = jax.random.PRNGKey(0)
    kx, k1, k2, k3, k4 = jax.random.split(key, 5)

    x = jax.random.normal(kx, (batch, seq, input_dim), dtype=jnp.float32)

    # deterministic synthetic parameters (PyTorch nn.Linear layout: (out, in))
    w1 = jax.random.normal(k1, (hidden, input_dim), dtype=jnp.float32) * 0.1
    b1 = jax.random.normal(k2, (hidden,), dtype=jnp.float32) * 0.01
    w2 = jax.random.normal(k3, (out_dim, hidden), dtype=jnp.float32) * 0.1
    b2 = jax.random.normal(k4, (out_dim,), dtype=jnp.float32) * 0.01

    # One-time parameter prep (transpose / lane-pad / reshape), then apply.
    prepared = prepare_nonlinear_head_params(w1, b1, w2, b2)
    out = nonlinear_head_apply(x, prepared)
    out = jax.block_until_ready(out)

    ref = _ref_forward(x, w1, b1, w2, b2)
    assert out.shape == (batch, seq, out_dim), out.shape
    assert jnp.allclose(out, ref, atol=1e-4, rtol=1e-4), float(
        jnp.max(jnp.abs(out - ref)))

    print("KERNEL_OK")
</pallas_src>

<mosaic_0001>
module attributes {stable_mosaic.version = 11 : i64} {
  func.func @_nonlinear_head_kernel(%arg0: i32, %arg1: memref<16x32xf32, #tpu.memory_space<vmem>>, %arg2: memref<32x32xf32, #tpu.memory_space<vmem>>, %arg3: memref<1x32xf32, #tpu.memory_space<vmem>>, %arg4: memref<32x128xf32, #tpu.memory_space<vmem>>, %arg5: memref<1x128xf32, #tpu.memory_space<vmem>>, %arg6: memref<16x128xf32, #tpu.memory_space<vmem>>) attributes {dimension_semantics = [#tpu.dimension_semantics<parallel>], iteration_bounds = array<i64: 1>, scalar_prefetch = 0 : i64, scratch_operands = 0 : i64, tpu.core_type = #tpu.core_type<tc>, window_params = [{transform_indices = @transform_0, window_bounds = array<i64: 16, 32>}, {pipeline_mode = #tpu.pipeline_mode<synchronous>, transform_indices = @transform_1, window_bounds = array<i64: 32, 32>}, {pipeline_mode = #tpu.pipeline_mode<synchronous>, transform_indices = @transform_2, window_bounds = array<i64: 1, 32>}, {pipeline_mode = #tpu.pipeline_mode<synchronous>, transform_indices = @transform_3, window_bounds = array<i64: 32, 128>}, {pipeline_mode = #tpu.pipeline_mode<synchronous>, transform_indices = @transform_4, window_bounds = array<i64: 1, 128>}, {transform_indices = @transform_5, window_bounds = array<i64: 16, 128>}]} {
    %c0 = arith.constant 0 : index
    %c0_0 = arith.constant 0 : index
    %0 = vector.load %arg1[%c0, %c0_0] : memref<16x32xf32, #tpu.memory_space<vmem>>, vector<16x32xf32>
    %c0_1 = arith.constant 0 : index
    %c0_2 = arith.constant 0 : index
    %1 = vector.load %arg2[%c0_1, %c0_2] : memref<32x32xf32, #tpu.memory_space<vmem>>, vector<32x32xf32>
    %cst = arith.constant dense<0.000000e+00> : vector<16x32xf32>
    %2 = tpu.matmul %0, %1, %cst {dimension_numbers = #tpu.dot_dimension_numbers<[1], [0], [0], [1], [0, 0, 1, 1], [], []>} : vector<16x32xf32>, vector<32x32xf32>, vector<16x32xf32> -> vector<16x32xf32>
    %c0_3 = arith.constant 0 : index
    %c0_4 = arith.constant 0 : index
    %3 = vector.load %arg3[%c0_3, %c0_4] : memref<1x32xf32, #tpu.memory_space<vmem>>, vector<1x32xf32>
    %4 = vector.broadcast %3 : vector<1x32xf32> to vector<16x32xf32>
    %5 = arith.addf %2, %4 : vector<16x32xf32>
    %cst_5 = arith.constant 5.000000e-01 : f32
    %6 = vector.broadcast %cst_5 : f32 to vector<16x32xf32>
    %7 = arith.mulf %6, %5 : vector<16x32xf32>
    %cst_6 = arith.constant 0.707106769 : f32
    %8 = vector.broadcast %cst_6 : f32 to vector<16x32xf32>
    %9 = arith.mulf %5, %8 : vector<16x32xf32>
    %10 = math.erf %9 : vector<16x32xf32>
    %cst_7 = arith.constant 1.000000e+00 : f32
    %11 = vector.broadcast %cst_7 : f32 to vector<16x32xf32>
    %12 = arith.addf %11, %10 : vector<16x32xf32>
    %13 = arith.mulf %7, %12 : vector<16x32xf32>
    %c0_8 = arith.constant 0 : index
    %c0_9 = arith.constant 0 : index
    %14 = vector.load %arg4[%c0_8, %c0_9] : memref<32x128xf32, #tpu.memory_space<vmem>>, vector<32x128xf32>
    %cst_10 = arith.constant dense<0.000000e+00> : vector<16x128xf32>
    %15 = tpu.matmul %13, %14, %cst_10 {dimension_numbers = #tpu.dot_dimension_numbers<[1], [0], [0], [1], [0, 0, 1, 1], [], []>} : vector<16x32xf32>, vector<32x128xf32>, vector<16x128xf32> -> vector<16x128xf32>
    %c0_11 = arith.constant 0 : index
    %c0_12 = arith.constant 0 : index
    %16 = vector.load %arg5[%c0_11, %c0_12] : memref<1x128xf32, #tpu.memory_space<vmem>>, vector<1x128xf32>
    %17 = vector.broadcast %16 : vector<1x128xf32> to vector<16x128xf32>
    %18 = arith.addf %15, %17 : vector<16x128xf32>
    %c0_13 = arith.constant 0 : index
    %c0_14 = arith.constant 0 : index
    %19 = vector.load %arg6[%c0_13, %c0_14] : memref<16x128xf32, #tpu.memory_space<vmem>>, vector<16x128xf32>
    tpu.vector_store %arg6[%c0_13, %c0_14], %18 {strides = array<i32>} : memref<16x128xf32, #tpu.memory_space<vmem>>, vector<16x128xf32>,
    return
  }
  func.func @transform_0(%arg0: i32) -> (i32, i32) {
    %c0_i32 = arith.constant 0 : i32
    %c0_i32_0 = arith.constant 0 : i32
    return %arg0, %c0_i32 : i32, i32
  }
  func.func @transform_1(%arg0: i32) -> (i32, i32) {
    %c0_i32 = arith.constant 0 : i32
    %c0_i32_0 = arith.constant 0 : i32
    %c0_i32_1 = arith.constant 0 : i32
    return %c0_i32, %c0_i32_0 : i32, i32
  }
  func.func @transform_2(%arg0: i32) -> (i32, i32) {
    %c0_i32 = arith.constant 0 : i32
    %c0_i32_0 = arith.constant 0 : i32
    %c0_i32_1 = arith.constant 0 : i32
    return %c0_i32, %c0_i32_0 : i32, i32
  }
  func.func @transform_3(%arg0: i32) -> (i32, i32) {
    %c0_i32 = arith.constant 0 : i32
    %c0_i32_0 = arith.constant 0 : i32
    %c0_i32_1 = arith.constant 0 : i32
    return %c0_i32, %c0_i32_0 : i32, i32
  }
  func.func @transform_4(%arg0: i32) -> (i32, i32) {
    %c0_i32 = arith.constant 0 : i32
    %c0_i32_0 = arith.constant 0 : i32
    %c0_i32_1 = arith.constant 0 : i32
    return %c0_i32, %c0_i32_0 : i32, i32
  }
  func.func @transform_5(%arg0: i32) -> (i32, i32) {
    %c0_i32 = arith.constant 0 : i32
    %c0_i32_0 = arith.constant 0 : i32
    return %arg0, %c0_i32 : i32, i32
  }
}

</mosaic_0001>

<bundles_post_ra>
// kernel: tpu_custom_call.1
= control target key start
LH: loop header
LB: loop body
LE: loop exit
PB: predicated region body
PF: predicated region fallthrough
CT: control target
= control target key end

     0   :  { %10 = vsyncpa [#allocation3], 0  ;;  %s471_s0 = inlined_call_operand.hbm [shape: f32[16,32], index: 0, kind: input, shape index: {}]   ;;  %s472_s1 = inlined_call_operand.hbm [shape: f32[32,32], index: 1, kind: input, shape index: {}]   ;;  %s473_s2 = inlined_call_operand.vmem [shape: f32[1,32], index: 2, kind: input, shape index: {}]   ;;  %s474_s3 = inlined_call_operand.hbm [shape: f32[32,128], index: 3, kind: input, shape index: {}]   ;;  %s475_s4 = inlined_call_operand.vmem [shape: f32[1,128], index: 4, kind: input, shape index: {}]   ;;  %s476_s5 = inlined_call_operand.hbm [shape: f32[16,128], index: 5, kind: output, shape index: {}]  }
   0x1   :  { %11 = vsyncpa [#allocation6], 0 }
   0x2   :  { %12 = vsyncpa [#allocation4], 0  ;;  %s30_s20 = sshll.u32 %s472_s1, 4  ;;  %s383_s21 = smov [#allocation5]   ;;  %s31_s20 = int_to_ptr.hbm [resolvable:$true] %s30_s20 }
   0x3   :  { %s32_s22 = sshll.u32 %s383_s21, 4  ;;  %s17_s25 = sshll.u32 %s471_s0, 4  ;;  %s33_s22 = int_to_ptr.vmem [resolvable:$true] %s32_s22  ;;  %s18_s25 = int_to_ptr.hbm [resolvable:$true] %s17_s25 }
   0x4   :  { %s384_s26 = smov 128   ;;  %s385_s27 = smov 8  }
   0x5   :  { %38 = dma.hbm_to_vmem [thread:$0]  %s31_s20, 512, %s33_s22, [#allocation6], %s384_s26, %s384_s26, %s385_s27  }
   0x6   :  { %s386_s28 = smov [#allocation2]   ;;  %s45_s1 = sshll.u32 %s474_s3, 4  ;;  %s46_s1 = int_to_ptr.hbm [resolvable:$true] %s45_s1 }
   0x7   :  { %s19_s29 = sshll.u32 %s386_s28, 4  ;;  %s387_s0 = smov [#allocation7]   ;;  %s20_s29 = int_to_ptr.vmem [resolvable:$true] %s19_s29 }
   0x8   :  { %25 = dma.hbm_to_vmem [thread:$0]  %s18_s25, 256, %s20_s29, [#allocation3], %s384_s26, %s384_s26, %s385_s27  }
   0x9   :  { %s47_s7 = sshll.u32 %s387_s0, 4  ;;  %s48_s7 = int_to_ptr.vmem [resolvable:$true] %s47_s7 }
   0xa   :  { %53 = dma.hbm_to_vmem [thread:$0]  %s46_s1, 512, %s48_s7, [#allocation6], %s384_s26, %s384_s26, %s385_s27  }
   0xb   :  { %377 = dma.done.wait [#allocation3], 256  }
   0xc   :  { %378 = vsyncadd [#allocation3], 4294967040 }
   0xd   :  { %379 = dma.done.wait [#allocation6], 1024  }
   0xe   :  { %380 = vsyncadd [#allocation6], 4294966272  ;;  %v73_v0 = vld [vmem:[#allocation5 + $0x18] sm:$0xff]  ;;  %v72_v1 = vld [vmem:[#allocation5 + $0x10] sm:$0xff]  ;;  %vm78_vm0 = vcmask 261120   ;;  %s388_s10 = smov [#allocation8]  }
   0xf   :  { %97 = vmatpush.msra.mxu0 %v73_v0  ;;  %261 = vmatpush.msra.mxu2 %v73_v0  ;;  %v71_v2 = vld [vmem:[#allocation5 + $0x8] sm:$0xff]  ;;  %v70_v3 = vld [vmem:[#allocation5] sm:$0xff]  ;;  %v68_v4 = vld [vmem:[#allocation2] sm:$0xff]  ;;  %s239_s11 = sshll.u32 %s388_s10, 4  ;;  %s241_s14 = sshll.u32 %s476_s5, 4  ;;  %s240_s11 = int_to_ptr.vmem [resolvable:$true] %s239_s11  ;;  %s242_s14 = int_to_ptr.hbm [resolvable:$true] %s241_s14 }
  0x10   :  { %v69_v5 = vld [vmem:[#allocation2 + $0x8] sm:$0xff]  ;;  %v275_v6 = vld [vmem:[%s473_s2] ss:$0 sm:$0xff]  ;;  %v197_v36 = vld [vmem:[#allocation7 + $0x8] sm:$0xff] }
  0x11   :  { %98 = vmatpush.msra.mxu0 %v72_v1  ;;  %262 = vmatpush.msra.mxu2 %v72_v1  ;;  %v199_v27 = vld [vmem:[#allocation7 + $0x18] sm:$0xff]  ;;  %v198_v31 = vld [vmem:[#allocation7 + $0x10] sm:$0xff]  ;;  %v196_v38 = vld [vmem:[#allocation7] sm:$0xff] }
  0x12   :  { %222 = vmatpush.msra.mxu1 %v199_v27  ;;  %265 = vmatpush.msra.mxu3 %v199_v27 }
  0x13   :  { %99 = vmatpush.msra.mxu0 %v71_v2  ;;  %263 = vmatpush.msra.mxu2 %v71_v2 }
  0x14   :  { %223 = vmatpush.msra.mxu1 %v198_v31  ;;  %266 = vmatpush.msra.mxu3 %v198_v31 }
  0x15   :  { %100 = vmatpush.msra.mxu0 %v70_v3  ;;  %264 = vmatpush.msra.mxu2 %v70_v3 }
  0x16   :  { %255 = vmatmul.msk.f32.vlgmr.msra.gmra.mxu0 %vm78_vm0, %v68_v4  ;;  %256 = vmatmul.msk.f32.vlgmr.msra.gmra.mxu2 %vm78_vm0, %v69_v5 }
  0x17   :  { %224 = vmatpush.msra.mxu1 %v197_v36  ;;  %267 = vmatpush.msra.mxu3 %v197_v36 }
  0x19   :  { %225 = vmatpush.msra.mxu1 %v196_v38  ;;  %268 = vmatpush.msra.mxu3 %v196_v38 }
  0x93   :  { %v102_v7 = vpop.f32.mrf.mxu0 }
  0x94   :  { %v442_v8 = vadd.f32 %v275_v6, %v102_v7 }
  0x96   :  { %v445_v9 = vmul.f32 0.70710677, %v442_v8 }
  0x98   :  { %v112_v10 = vmul.f32 %v445_v9, %v445_v9 }
  0x99   :  { %v105_v11 = vpop.f32.mrf.mxu2 }
  0x9a   :  { %v113_v12 = vmin.f32 %v112_v10, 16.0  ;;  %v449_v13 = vadd.f32 %v275_v6, %v105_v11 }
  0x9c   :  { %v114_v14 = vmul.f32 2.1237322e-06, %v113_v12  ;;  %v125_v15 = vmul.f32 3.8918573e-05, %v113_v12  ;;  %v452_v16 = vmul.f32 0.70710677, %v449_v13 }
  0x9e   :  { %v115_v17 = vadd.f32 0.00028619796, %v114_v14  ;;  %v126_v18 = vadd.f32 0.001143296, %v125_v15  ;;  %v152_v19 = vmul.f32 %v452_v16, %v452_v16 }
  0xa0   :  { %v116_v20 = vmul.f32 %v115_v17, %v113_v12  ;;  %v127_v21 = vmul.f32 %v126_v18, %v113_v12  ;;  %v153_v22 = vmin.f32 %v152_v19, 16.0 }
  0xa2   :  { %v117_v23 = vadd.f32 0.0036580483, %v116_v20  ;;  %v128_v24 = vadd.f32 0.014752088, %v127_v21  ;;  %v154_v25 = vmul.f32 2.1237322e-06, %v153_v22 }
  0xa3   :  { %v165_v26 = vmul.f32 3.8918573e-05, %v153_v22  ;;  %v108_v21 = vmul.f32 0.5, %v442_v8  ;;  %v276_v8 = vld [vmem:[%s475_s4] ss:$0 sm:$0xff] }
  0xa4   :  { %v129_v28 = vmul.f32 %v128_v24, %v113_v12  ;;  %v155_v29 = vadd.f32 0.00028619796, %v154_v25  ;;  %v118_v33 = vmul.f32 %v117_v23, %v113_v12 }
  0xa5   :  { %v166_v30 = vadd.f32 0.001143296, %v165_v26 }
  0xa6   :  { %v130_v32 = vadd.f32 0.112945676, %v129_v28  ;;  %v156_v34 = vmul.f32 %v155_v29, %v153_v22  ;;  %v119_v42 = vadd.f32 0.05243302, %v118_v33  ;;  %v109_v29 = vmul.f32 0.5, %v449_v13 }
  0xa7   :  { %v167_v35 = vmul.f32 %v166_v30, %v153_v22 }
  0xa8   :  { %v131_v37 = vmul.f32 %v130_v32, %v113_v12  ;;  %v157_v41 = vadd.f32 0.0036580483, %v156_v34  ;;  %v120_v48 = vmul.f32 %v119_v42, %v113_v12 }
  0xa9   :  { %v168_v39 = vadd.f32 0.014752088, %v167_v35 }
  0xaa   :  { %v132_v40 = vadd.f32 0.4994258, %v131_v37  ;;  %v158_v47 = vmul.f32 %v157_v41, %v153_v22  ;;  %v121_v52 = vadd.f32 0.18741608, %v120_v48 }
  0xab   :  { %v169_v43 = vmul.f32 %v168_v39, %v153_v22 }
  0xac   :  { %v133_v44 = vmul.f32 %v132_v40, %v113_v12  ;;  %v159_v51 = vadd.f32 0.05243302, %v158_v47  ;;  %v122_v57 = vmul.f32 %v121_v52, %v113_v12 }
  0xad   :  { %v170_v45 = vadd.f32 0.112945676, %v169_v43 }
  0xae   :  { %v134_v46 = vadd.f32 1.0, %v133_v44  ;;  %v160_v56 = vmul.f32 %v159_v51, %v153_v22  ;;  %v123_v62 = vadd.f32 1.1283791, %v122_v57 }
  0xaf   :  { %v171_v49 = vmul.f32 %v170_v45, %v153_v22 }
  0xb0   :  { %277 = vrcp.f32 %v134_v46  ;;  %v146_v60 = vand.u32 2147483648, %v134_v46  ;;  %v161_v61 = vadd.f32 0.18741608, %v160_v56  ;;  %v144_v0 = vand.u32 2147483647, %v134_v46 }
  0xb1   :  { %v172_v50 = vadd.f32 0.4994258, %v171_v49  ;;  %vm140_vm2 = vweird.f32 %v134_v46  ;;  %v124_v6 = vmul.f32 %v123_v62, %v445_v9 }
  0xb2   :  { %v147_v3 = vor.u32 1.1754944e-38, %v146_v60  ;;  %v162_v4 = vmul.f32 %v161_v61, %v153_v22  ;;  %vm145_vm4 = vcmp.eq.f32.partialorder %v144_v0, 8.507059e+37 }
  0xb3   :  { %v173_v53 = vmul.f32 %v172_v50, %v153_v22 }
  0xb4   :  { %v163_v15 = vadd.f32 1.1283791, %v162_v4 }
  0xb5   :  { %v174_v54 = vadd.f32 1.0, %v173_v53 }
  0xb6   :  { %v278_v55 = vpop.eup %277  ;;  %v164_v9 = vmul.f32 %v163_v15, %v452_v16 }
  0xb7   :  { %v136_v58 = vmul.f32 %v278_v55, %v134_v46  ;;  %279 = vrcp.f32 %v174_v54  ;;  %vm141_vm1 = vweird.f32 %v278_v55  ;;  %v186_v14 = vand.u32 2147483648, %v174_v54 }
  0xb8   :  { %vm142_vm3 = vmor %vm140_vm2, %vm141_vm1  ;;  %v184_v18 = vand.u32 2147483647, %v174_v54  ;;  %vm180_vm6 = vweird.f32 %v174_v54 }
  0xb9   :  { %v137_v59 = vsub.f32 1.0, %v136_v58  ;;  %v187_v22 = vor.u32 1.1754944e-38, %v186_v14 }
  0xba   :  { %vm185_vm8 = vcmp.eq.f32.partialorder %v184_v18, 8.507059e+37 }
  0xbb   :  { %v138_v63 = vmul.f32 %v278_v55, %v137_v59 }
  0xbd   :  { %v280_v1 = vpop.eup %279  ;;  %v139_v2 = vadd.f32 %v278_v55, %v138_v63 }
  0xbe   :  { %v176_v5 = vmul.f32 %v280_v1, %v174_v54  ;;  %vm181_vm5 = vweird.f32 %v280_v1 }
  0xbf   :  { %v143_v7 = vsel %vm142_vm3, %v278_v55, %v139_v2  ;;  %vm182_vm7 = vmor %vm180_vm6, %vm181_vm5 }
  0xc0   :  { %v148_v10 = vsel %vm145_vm4, %v147_v3, %v143_v7  ;;  %v177_v11 = vsub.f32 1.0, %v176_v5 }
  0xc1   :  { %v149_v12 = vmul.f32 %v148_v10, %v124_v6 }
  0xc2   :  { %v178_v17 = vmul.f32 %v280_v1, %v177_v11 }
  0xc3   :  { %v257_v19 = vclamps-f32 %v149_v12, 1.0 }
  0xc4   :  { %v179_v20 = vadd.f32 %v280_v1, %v178_v17 }
  0xc5   :  { %v192_v23 = vadd.f32 1.0, %v257_v19 }
  0xc6   :  { %v183_v24 = vsel %vm182_vm7, %v280_v1, %v179_v20 }
  0xc7   :  { %v188_v25 = vsel %vm185_vm8, %v187_v22, %v183_v24  ;;  %v194_v26 = vmul.f32 %v192_v23, %v108_v21 }
  0xc8   :  { %v189_v27 = vmul.f32 %v188_v25, %v164_v9 }
  0xc9   :  { %259 = vmatmul.msk.f32.vlgmr.msra.gmra.mxu1 %vm78_vm0, %v194_v26 }
  0xca   :  { %v258_v28 = vclamps-f32 %v189_v27, 1.0 }
  0xcc   :  { %v193_v30 = vadd.f32 1.0, %v258_v28 }
  0xce   :  { %v195_v31 = vmul.f32 %v193_v30, %v109_v29 }
  0xd0   :  { %260 = vmatmul.msk.f32.vlgmr.msra.gmra.mxu3 %vm78_vm0, %v195_v31 }
 0x146   :  { %v227_v32 = vpop.f32.mrf.mxu1 }
 0x147   :  { %v228_v16 = vadd.f32 %v276_v8, %v227_v32 }
 0x149   :  { %233 = vst [vmem:[#allocation8] sm:$0xff] %v228_v16 }
 0x153   :  { %v230_v33 = vpop.f32.mrf.mxu3 }
 0x154   :  { %v231_v34 = vadd.f32 %v276_v8, %v230_v33 }
 0x156   :  { %234 = vst [vmem:[#allocation8 + $0x8] sm:$0xff] %v231_v34 }
 0x157   :  { %247 = dma.vmem_to_hbm [thread:$0]  %s240_s11, 256, %s242_s14, [#allocation4], %s384_s26, %s384_s26, %s385_s27  }
 0x158   :  { %381 = dma.done.wait [#allocation4], 256  }
 0x159   :  { %382 = vsyncadd [#allocation4], 4294967040 }
 0x15a   :  { %252 = vsyncpa [#allocation3], 1 }
 0x15b   :  { %253 = vsyncpa [#allocation6], 1 }
 0x15c   :  { %254 = vsyncpa [#allocation4], 1 }

</bundles_post_ra>
